<compile_context>
chip_gen: v7x
topology: tpu7x:2x2x1
jax: 0.10.0
libtpu: 0.0.40
codegen_flags: <defaults>
</compile_context>

<pallas_src>
import math

import jax
import jax.numpy as jnp
from jax.experimental import pallas as pl
from jax.experimental.pallas import tpu as pltpu

# VariFL hyper-parameters (module __init__ defaults; no learnable weights).
GAMMA = 2.0
ALPHA = 0.75

LANES = 128              # lane width
TILE_ROWS = 8            # f32 vreg sublane height (psum fold granularity)
ROW_ALIGN = 32           # block/chunk row alignment (covers f32/bf16/int8 packing)
CHUNK_TARGET_ROWS = 256  # in-kernel chunk (~128 KiB f32) - keeps temps register-sized
MIN_BLOCK_ROWS = 1024    # don't shrink blocks below this just to add grid steps
MAX_BLOCK_ROWS = 4096    # 2 MiB f32 per buffer per block
TARGET_GRID = 8          # aim for >= 8 blocks on large inputs (v7x megacore balance)
PAD_LOGIT = -100.0       # sentinel: BCE(x=-100, z=0) == 0 exactly in f32 (FTZ)


def _cdiv(a, b):
    return -(-a // b)


def _round_up(a, b):
    return _cdiv(a, b) * b


def _pick_block_rows(rows):
    """Balanced near-max blocks; never degenerates to tiny blocks."""
    n_blocks = max(_cdiv(rows, MAX_BLOCK_ROWS),
                   min(TARGET_GRID, _cdiv(rows, MIN_BLOCK_ROWS)))
    return _round_up(_cdiv(rows, n_blocks), ROW_ALIGN)


def _pick_chunk_rows(block_rows):
    """Largest chunk <= CHUNK_TARGET_ROWS (32-row aligned) dividing block_rows."""
    c = min(block_rows, CHUNK_TARGET_ROWS)
    while block_rows % c != 0:
        c -= ROW_ALIGN
    return c


def _make_varifl_kernel(block_rows, chunk_rows):
    n_chunks = block_rows // chunk_rows

    def kernel(pred_ref, tgt_ref, fw_ref, psum_ref):
        acc = jnp.zeros((TILE_ROWS, LANES), jnp.float32)
        # Static chunk loop: each chunk's intermediates stay vreg-sized; the
        # BCE partial sum folds sublane-tiles onto one (8,128) accumulator
        # (pure VPU adds, no XLU reduce, no block-sized VMEM temp).
        for c in range(n_chunks):
            sl = pl.ds(c * chunk_rows, chunk_rows)
            x = pred_ref[sl, :].astype(jnp.float32)
            z = tgt_ref[sl, :].astype(jnp.float32)

            sig = jax.nn.sigmoid(x)
            d = sig - z
            if GAMMA == 2.0:
                pw = d * d                       # exact fast path
            else:
                pw = jnp.abs(d) ** GAMMA         # general fallback
            # focal_weight = t (t > 0) ; alpha * |sigmoid(x) - t|^gamma (t <= 0)
            fw = jnp.where(z > 0.0, z, ALPHA * pw)
            fw_ref[sl, :] = fw.astype(fw_ref.dtype)

            # Stable BCE-with-logits: max(x,0) - x*z + log1p(exp(-|x|))
            bce = (jnp.maximum(x, 0.0) - x * z
                   + jnp.log1p(jnp.exp(-jnp.abs(x))))
            acc = acc + bce.reshape(-1, TILE_ROWS, LANES).sum(axis=0)

        psum_ref[...] = acc

    return kernel


def varifl_loss(pred, target):
    assert pred.shape == target.shape
    orig_shape = pred.shape
    out_dtype = pred.dtype
    total = math.prod(orig_shape)

    # target.type_as(pred)
    p1 = pred.reshape(-1)
    t1 = target.reshape(-1).astype(pred.dtype)

    rows = _cdiv(total, LANES)
    block_rows = _pick_block_rows(rows)
    n_blocks = _cdiv(rows, block_rows)
    padded_rows = n_blocks * block_rows
    padded_total = padded_rows * LANES
    chunk_rows = _pick_chunk_rows(block_rows)

    # Pad with a sentinel whose BCE contribution is exactly zero; the padded
    # focal weights are sliced off below and the mean divisor is `total`.
    if padded_total != total:
        pad = padded_total - total
        p1 = jnp.pad(p1, (0, pad), constant_values=PAD_LOGIT)
        t1 = jnp.pad(t1, (0, pad), constant_values=0)

    p2 = p1.reshape(padded_rows, LANES)
    t2 = t1.reshape(padded_rows, LANES)

    # Explicit scoped-VMEM budget: double-buffered (pred, target, fw) blocks
    # plus headroom. Safe on all generations (well under v7x's 64 MiB physical).
    itemsize = p2.dtype.itemsize
    dbl_buf_bytes = block_rows * LANES * 2 * 3 * itemsize
    vmem_limit = int(min(48 << 20, max(24 << 20, dbl_buf_bytes + (4 << 20))))

    kernel = _make_varifl_kernel(block_rows, chunk_rows)

    fw, psum = pl.pallas_call(
        kernel,
        out_shape=(
            # fw in input dtype: halves the biggest HBM write for bf16 inputs.
            jax.ShapeDtypeStruct((padded_rows, LANES), pred.dtype),
            jax.ShapeDtypeStruct((n_blocks * TILE_ROWS, LANES), jnp.float32),
        ),
        grid_spec=pltpu.PrefetchScalarGridSpec(
            num_scalar_prefetch=0,
            grid=(n_blocks,),
            in_specs=[
                pl.BlockSpec((block_rows, LANES), lambda i: (i, 0)),
                pl.BlockSpec((block_rows, LANES), lambda i: (i, 0)),
            ],
            out_specs=(
                pl.BlockSpec((block_rows, LANES), lambda i: (i, 0)),
                pl.BlockSpec((TILE_ROWS, LANES), lambda i: (i, 0)),
            ),
        ),
        compiler_params=pltpu.CompilerParams(
            dimension_semantics=("parallel",),
            vmem_limit_bytes=vmem_limit,
        ),
    )(p2, t2)

    # reduction='mean' glue + scalar broadcast multiply (fuses in XLA; fw is
    # re-read in its narrow dtype, divisor excludes padding).
    scale = jnp.sum(psum) / jnp.float32(total)
    loss = (fw.reshape(-1)[:total] * scale).astype(out_dtype)
    return loss.reshape(orig_shape)


def _varifl_ref(pred, target):
    """Pure-JAX reference mirroring the PyTorch forward exactly."""
    sig = jax.nn.sigmoid(pred)
    target = target.astype(pred.dtype)
    pos = (target > 0.0).astype(pred.dtype)
    neg = (target <= 0.0).astype(pred.dtype)
    fw = target * pos + ALPHA * jnp.abs(sig - target) ** GAMMA * neg
    bce = jnp.mean(
        jnp.maximum(pred, 0.0) - pred * target
        + jnp.log1p(jnp.exp(-jnp.abs(pred)))
    )
    return bce * fw


if __name__ == "__main__":
    key = jax.random.PRNGKey(0)
    k1, k2, k3 = jax.random.split(key, 3)

    B, C, H, W = 2, 4, 16, 16
    pred = jax.random.normal(k1, (B, C, H, W), dtype=jnp.float32)
    # IoU-style targets in [0, 1], with ~half of them zeroed (negatives).
    tgt_vals = jax.random.uniform(k2, (B, C, H, W), dtype=jnp.float32)
    tgt_mask = (jax.random.uniform(k3, (B, C, H, W)) > 0.5).astype(jnp.float32)
    target = tgt_vals * tgt_mask

    out = jax.block_until_ready(varifl_loss(pred, target))
    ref = _varifl_ref(pred, target)
    assert out.shape == (B, C, H, W)
    assert jnp.allclose(out, ref, rtol=1e-5, atol=1e-6), (
        f"max abs diff = {jnp.max(jnp.abs(out - ref))}")

    # Awkward element count (3*5*7*11 = 1155) exercises the padding path.
    p_odd = jax.random.normal(k1, (3, 5, 7, 11), dtype=jnp.float32)
    t_odd = (jax.random.uniform(k2, (3, 5, 7, 11), dtype=jnp.float32)
             * (jax.random.uniform(k3, (3, 5, 7, 11)) > 0.5).astype(jnp.float32))
    out_odd = jax.block_until_ready(varifl_loss(p_odd, t_odd))
    ref_odd = _varifl_ref(p_odd, t_odd)
    assert jnp.allclose(out_odd, ref_odd, rtol=1e-5, atol=1e-6), (
        f"max abs diff (padded path) = {jnp.max(jnp.abs(out_odd - ref_odd))}")

    print("KERNEL_OK")
</pallas_src>

<mosaic_0001>
module attributes {stable_mosaic.version = 11 : i64} {
  func.func @kernel(%arg0: i32, %arg1: memref<32x128xf32, #tpu.memory_space<vmem>>, %arg2: memref<32x128xf32, #tpu.memory_space<vmem>>, %arg3: memref<32x128xf32, #tpu.memory_space<vmem>>, %arg4: memref<8x128xf32, #tpu.memory_space<vmem>>) attributes {dimension_semantics = [#tpu.dimension_semantics<parallel>], iteration_bounds = array<i64: 1>, scalar_prefetch = 0 : i64, scratch_operands = 0 : i64, tpu.core_type = #tpu.core_type<tc>, window_params = [{transform_indices = @transform_0, window_bounds = array<i64: 32, 128>}, {transform_indices = @transform_1, window_bounds = array<i64: 32, 128>}, {transform_indices = @transform_2, window_bounds = array<i64: 32, 128>}, {transform_indices = @transform_3, window_bounds = array<i64: 8, 128>}]} {
    %cst = arith.constant 0.000000e+00 : f32
    %0 = vector.broadcast %cst : f32 to vector<8x128xf32>
    %c0 = arith.constant 0 : index
    %c0_0 = arith.constant 0 : index
    %1 = vector.load %arg1[%c0, %c0_0] : memref<32x128xf32, #tpu.memory_space<vmem>>, vector<32x128xf32>
    %c0_1 = arith.constant 0 : index
    %c0_2 = arith.constant 0 : index
    %2 = vector.load %arg2[%c0_1, %c0_2] : memref<32x128xf32, #tpu.memory_space<vmem>>, vector<32x128xf32>
    %3 = arith.negf %1 : vector<32x128xf32>
    %4 = math.exp %3 : vector<32x128xf32>
    %cst_3 = arith.constant 1.000000e+00 : f32
    %5 = vector.broadcast %cst_3 : f32 to vector<32x128xf32>
    %6 = arith.addf %5, %4 : vector<32x128xf32>
    %7 = arith.divf %5, %6 : vector<32x128xf32>
    %8 = arith.subf %7, %2 : vector<32x128xf32>
    %9 = arith.mulf %8, %8 : vector<32x128xf32>
    %cst_4 = arith.constant 0.000000e+00 : f32
    %10 = vector.broadcast %cst_4 : f32 to vector<32x128xf32>
    %11 = arith.cmpf ogt, %2, %10 : vector<32x128xf32>
    %cst_5 = arith.constant 7.500000e-01 : f32
    %12 = vector.broadcast %cst_5 : f32 to vector<32x128xf32>
    %13 = arith.mulf %12, %9 : vector<32x128xf32>
    %14 = arith.select %11, %2, %13 : vector<32x128xi1>, vector<32x128xf32>
    %c0_6 = arith.constant 0 : index
    %c0_7 = arith.constant 0 : index
    %15 = vector.load %arg3[%c0_6, %c0_7] : memref<32x128xf32, #tpu.memory_space<vmem>>, vector<32x128xf32>
    tpu.vector_store %arg3[%c0_6, %c0_7], %14 {strides = array<i32>} : memref<32x128xf32, #tpu.memory_space<vmem>>, vector<32x128xf32>,
    %cst_8 = arith.constant 0.000000e+00 : f32
    %16 = vector.broadcast %cst_8 : f32 to vector<32x128xf32>
    %17 = arith.maximumf %1, %16 : vector<32x128xf32>
    %18 = arith.mulf %1, %2 : vector<32x128xf32>
    %19 = arith.subf %17, %18 : vector<32x128xf32>
    %20 = math.absf %1 : vector<32x128xf32>
    %cst_9 = arith.constant 0.000000e+00 : f32
    %21 = vector.broadcast %cst_9 : f32 to vector<32x128xf32>
    %22 = arith.subf %21, %20 : vector<32x128xf32>
    %23 = math.exp %22 : vector<32x128xf32>
    %24 = math.log1p %23 : vector<32x128xf32>
    %25 = arith.addf %19, %24 : vector<32x128xf32>
    %26 = vector.shape_cast %25 : vector<32x128xf32> to vector<4x8x128xf32>
    %cst_10 = arith.constant dense<0.000000e+00> : vector<8x128xf32>
    %27 = vector.multi_reduction <add>, %26, %cst_10 [0] : vector<4x8x128xf32> to vector<8x128xf32>
    %28 = arith.addf %0, %27 : vector<8x128xf32>
    %c0_11 = arith.constant 0 : index
    %c0_12 = arith.constant 0 : index
    %29 = vector.load %arg4[%c0_11, %c0_12] : memref<8x128xf32, #tpu.memory_space<vmem>>, vector<8x128xf32>
    tpu.vector_store %arg4[%c0_11, %c0_12], %28 {strides = array<i32>} : memref<8x128xf32, #tpu.memory_space<vmem>>, vector<8x128xf32>,
    return
  }
  func.func @transform_0(%arg0: i32) -> (i32, i32) {
    %c0_i32 = arith.constant 0 : i32
    %c0_i32_0 = arith.constant 0 : i32
    return %arg0, %c0_i32 : i32, i32
  }
  func.func @transform_1(%arg0: i32) -> (i32, i32) {
    %c0_i32 = arith.constant 0 : i32
    %c0_i32_0 = arith.constant 0 : i32
    return %arg0, %c0_i32 : i32, i32
  }
  func.func @transform_2(%arg0: i32) -> (i32, i32) {
    %c0_i32 = arith.constant 0 : i32
    %c0_i32_0 = arith.constant 0 : i32
    return %arg0, %c0_i32 : i32, i32
  }
  func.func @transform_3(%arg0: i32) -> (i32, i32) {
    %c0_i32 = arith.constant 0 : i32
    %c0_i32_0 = arith.constant 0 : i32
    return %arg0, %c0_i32 : i32, i32
  }
}

</mosaic_0001>

<bundles_post_ra>
// kernel: tpu_custom_call.1
= control target key start
LH: loop header
LB: loop body
LE: loop exit
PB: predicated region body
PF: predicated region fallthrough
CT: control target
= control target key end

     0   :  { %9 = vsyncpa [#allocation3], 0  ;;  %s503_s0 = inlined_call_operand.hbm [shape: f32[32,128], index: 0, kind: input, shape index: {}]   ;;  %s504_s1 = inlined_call_operand.hbm [shape: f32[32,128], index: 1, kind: input, shape index: {}]   ;;  %s505_s2 = inlined_call_operand.hbm [shape: f32[32,128], index: 2, kind: output, shape index: {0}]   ;;  %s506_s3 = inlined_call_operand.hbm [shape: f32[8,128], index: 3, kind: output, shape index: {1}]  }
   0x1   :  { %10 = vsyncpa [#allocation6], 0 }
   0x2   :  { %11 = vsyncpa [#allocation4], 0 }
   0x3   :  { %12 = vsyncpa [#allocation9], 0  ;;  %s342_s12 = smov [#allocation2]   ;;  %s246_s16 = scalar_lea.hbm %s503_s0, 512 }
   0x4   :  { %s18_s13 = sshll.u32 %s342_s12, 4  ;;  %p247_p0 = scmp.ne.s32.totalorder %s503_s0, %s246_s16  ;;  %s19_s13 = int_to_ptr.vmem [resolvable:$true] %s18_s13 }
   0x5   :  { %p250_p1 = scmp.lt.u32.totalorder %s246_s16, %s503_s0 }
   0x7   :  { %p252_p2 = pnand %p250_p1, %p247_p0 }
   0x9   :  { %255 = shalt.err (!%p252_p2)
}
   0xa   :  { %s256_s21 = scalar_lea.vmem %s19_s13, 512  ;;  %p261_p4 = scmp.lt.s32.totalorder %s19_s13, %s19_s13 }
   0xb   :  { %p257_p3 = scmp.ne.s32.totalorder %s19_s13, %s256_s21  ;;  %p262_p5 = scmp.lt.s32.totalorder %s256_s21, %s256_s21 }
   0xd   :  { %p263_p6 = por %p262_p5, %p261_p4 }
   0xf   :  { %p264_p7 = pnand %p263_p6, %p257_p3 }
  0x11   :  { %267 = shalt.err (!%p264_p7)
}
  0x12   :  { %s343_s22 = smov 128   ;;  %s344_s23 = smov 8  }
  0x13   :  { %24 = dma.hbm_to_vmem [thread:$0]  %s503_s0, 512, %s19_s13, [#allocation3], %s343_s22, %s343_s22, %s344_s23  }
  0x14   :  { %s345_s26 = smov [#allocation5]   ;;  %s268_s30 = scalar_lea.hbm %s504_s1, 512 }
  0x15   :  { %s30_s27 = sshll.u32 %s345_s26, 4  ;;  %p269_p8 = scmp.ne.s32.totalorder %s504_s1, %s268_s30  ;;  %s31_s27 = int_to_ptr.vmem [resolvable:$true] %s30_s27 }
  0x16   :  { %p272_p9 = scmp.lt.u32.totalorder %s268_s30, %s504_s1 }
  0x18   :  { %p274_p10 = pnand %p272_p9, %p269_p8 }
  0x1a   :  { %277 = shalt.err (!%p274_p10)
}
  0x1b   :  { %s278_s8 = scalar_lea.vmem %s31_s27, 512  ;;  %p283_p12 = scmp.lt.s32.totalorder %s31_s27, %s31_s27 }
  0x1c   :  { %p279_p11 = scmp.ne.s32.totalorder %s31_s27, %s278_s8  ;;  %p284_p13 = scmp.lt.s32.totalorder %s278_s8, %s278_s8 }
  0x1e   :  { %p285_p0 = por %p284_p13, %p283_p12 }
  0x20   :  { %p286_p1 = pnand %p285_p0, %p279_p11 }
  0x22   :  { %289 = shalt.err (!%p286_p1)
}
  0x23   :  { %36 = dma.hbm_to_vmem [thread:$0]  %s504_s1, 512, %s31_s27, [#allocation6], %s343_s22, %s343_s22, %s344_s23  }
  0x24   :  { %334 = dma.done.wait [#allocation3], 512  }
  0x25   :  { %335 = vsyncadd [#allocation3], 4294966784 }
  0x26   :  { %336 = dma.done.wait [#allocation6], 512  }
  0x27   :  { %337 = vsyncadd [#allocation6], 4294966784  ;;  %v398_v0 = vld [vmem:[#allocation2] sm:$0xff]  ;;  %v400_v1 = vld [vmem:[#allocation2 + $0x8] sm:$0xff]  ;;  %s346_s1 = smov [#allocation7]   ;;  %s347_s11 = smov [#allocation8]  }
  0x28   :  { %v204_v2 = vmul.f32 -1.442695, %v398_v0  ;;  %v111_v3 = vand.u32 2147483647, %v398_v0  ;;  %v205_v4 = vmul.f32 -1.442695, %v400_v1 }
  0x29   :  { %v112_v5 = vand.u32 2147483647, %v400_v1  ;;  %v406_v6 = vld [vmem:[#allocation2 + $0x10] sm:$0xff]  ;;  %v410_v11 = vld [vmem:[#allocation2 + $0x18] sm:$0xff]  ;;  %v414_v27 = vld [vmem:[#allocation5] sm:$0xff]  ;;  %v99_v43 = vmax.f32 %v398_v0, 0.0 }
  0x2a   :  { %214 = vpow2.f32 %v204_v2  ;;  %v115_v7 = vsub.f32 0.0, %v111_v3  ;;  %v206_v8 = vmul.f32 -1.442695, %v406_v6  ;;  %v113_v9 = vand.u32 2147483647, %v406_v6  ;;  %v416_v28 = vld [vmem:[#allocation5 + $0x8] sm:$0xff] }
  0x2b   :  { %216 = vpow2.f32 %v205_v4  ;;  %v116_v10 = vsub.f32 0.0, %v112_v5  ;;  %v207_v15 = vmul.f32 -1.442695, %v410_v11  ;;  %v114_v16 = vand.u32 2147483647, %v410_v11  ;;  %v418_v30 = vld [vmem:[#allocation5 + $0x10] sm:$0xff] }
  0x2c   :  { %v119_v12 = vmul.f32 1.442695, %v115_v7  ;;  %218 = vpow2.f32 %v206_v8  ;;  %v117_v13 = vsub.f32 0.0, %v113_v9  ;;  %v103_v35 = vmul.f32 %v414_v27, %v398_v0  ;;  %v426_v39 = vld [vmem:[#allocation5 + $0x18] sm:$0xff]  ;;  %s177_s10 = sshll.u32 %s346_s1, 4  ;;  %s190_s12 = sshll.u32 %s347_s11, 4  ;;  %s178_s10 = int_to_ptr.vmem [resolvable:$true] %s177_s10  ;;  %s191_s12 = int_to_ptr.vmem [resolvable:$true] %s190_s12 }
  0x2d   :  { %v121_v14 = vmul.f32 1.442695, %v116_v10  ;;  %v118_v18 = vsub.f32 0.0, %v114_v16  ;;  %v104_v36 = vmul.f32 %v416_v28, %v400_v1  ;;  %v105_v38 = vmul.f32 %v418_v30, %v406_v6  ;;  %s290_s13 = scalar_lea.vmem %s178_s10, 512  ;;  %p295_p3 = scmp.lt.s32.totalorder %s178_s10, %s178_s10 }
  0x2e   :  { %220 = vpow2.f32 %v119_v12  ;;  %v123_v17 = vmul.f32 1.442695, %v117_v13  ;;  %v100_v44 = vmax.f32 %v400_v1, 0.0  ;;  %v101_v46 = vmax.f32 %v406_v6, 0.0  ;;  %p291_p2 = scmp.ne.s32.totalorder %s178_s10, %s290_s13  ;;  %p296_p4 = scmp.lt.s32.totalorder %s290_s13, %s290_s13 }
  0x2f   :  { %222 = vpow2.f32 %v121_v14  ;;  %v125_v19 = vmul.f32 1.442695, %v118_v18  ;;  %vm83_vm0 = vcmp.gt.f32.partialorder %v414_v27, 0.0  ;;  %v102_v49 = vmax.f32 %v410_v11, 0.0 }
  0x30   :  { %224 = vpow2.f32 %v123_v17  ;;  %v106_v50 = vmul.f32 %v426_v39, %v410_v11  ;;  %vm84_vm1 = vcmp.gt.f32.partialorder %v416_v28, 0.0  ;;  %vm85_vm2 = vcmp.gt.f32.partialorder %v418_v30, 0.0  ;;  %p297_p5 = por %p296_p4, %p295_p3 }
  0x31   :  { %226 = vpow2.f32 %v207_v15  ;;  %v107_v55 = vsub.f32 %v99_v43, %v103_v35  ;;  %v108_v60 = vsub.f32 %v100_v44, %v104_v36  ;;  %v109_v61 = vsub.f32 %v101_v46, %v105_v38 }
  0x32   :  { %228 = vpow2.f32 %v125_v19  ;;  %v110_v1 = vsub.f32 %v102_v49, %v106_v50  ;;  %vm86_vm7 = vcmp.gt.f32.partialorder %v426_v39, 0.0  ;;  %p298_p6 = pnand %p297_p5, %p291_p2 }
  0x34   :  { %v215_v20 = vpop.eup %214 }
  0x35   :  { %v217_v21 = vpop.eup %216  ;;  %v63_v22 = vadd.f32 1.0, %v215_v20 }
  0x36   :  { %v219_v23 = vpop.eup %218  ;;  %v64_v24 = vadd.f32 1.0, %v217_v21 }
  0x37   :  { %230 = vrcp.f32 %v63_v22  ;;  %v65_v25 = vadd.f32 1.0, %v219_v23 }
  0x38   :  { %v221_v26 = vpop.eup %220  ;;  %232 = vrcp.f32 %v64_v24 }
  0x39   :  { %v223_v29 = vpop.eup %222  ;;  %234 = vrcp.f32 %v65_v25  ;;  %v127_v31 = vadd.f32 1.0, %v221_v26  ;;  %v130_v41 = vmul.f32 -0.5, %v221_v26  ;;  %v133_v53 = vand.u32 2147483647, %v221_v26 }
  0x3a   :  { %v225_v32 = vpop.eup %224  ;;  %v136_v33 = vadd.f32 1.0, %v223_v29  ;;  %v139_v45 = vmul.f32 -0.5, %v223_v29  ;;  %v142_v57 = vand.u32 2147483647, %v223_v29 }
  0x3b   :  { %v227_v34 = vpop.eup %226  ;;  %236 = vlog2.f32 %v127_v31  ;;  %v145_v37 = vadd.f32 1.0, %v225_v32  ;;  %v148_v47 = vmul.f32 -0.5, %v225_v32  ;;  %v131_v52 = vadd.f32 1.0, %v130_v41 }
  0x3c   :  { %v66_v40 = vadd.f32 1.0, %v227_v34  ;;  %238 = vlog2.f32 %v136_v33  ;;  %v428_v42 = vpop.eup %228  ;;  %v140_v56 = vadd.f32 1.0, %v139_v45  ;;  %v151_v2 = vand.u32 2147483647, %v225_v32 }
  0x3d   :  { %240 = vlog2.f32 %v145_v37  ;;  %v154_v48 = vadd.f32 1.0, %v428_v42  ;;  %v157_v51 = vmul.f32 -0.5, %v428_v42  ;;  %v149_v62 = vadd.f32 1.0, %v148_v47 }
  0x3e   :  { %242 = vrcp.f32 %v66_v40  ;;  %v132_v6 = vmul.f32 %v221_v26, %v131_v52  ;;  %vm444_vm3 = vcmp.lt.f32.partialorder %v133_v53, 0.0004427343  ;;  %v141_v10 = vmul.f32 %v223_v29, %v140_v56 }
  0x3f   :  { %244 = vlog2.f32 %v154_v48  ;;  %v158_v3 = vadd.f32 1.0, %v157_v51  ;;  %vm448_vm4 = vcmp.lt.f32.partialorder %v142_v57, 0.0004427343  ;;  %v160_v12 = vand.u32 2147483647, %v428_v42 }
  0x40   :  { %v150_v17 = vmul.f32 %v225_v32, %v149_v62  ;;  %vm453_vm5 = vcmp.lt.f32.partialorder %v151_v2, 0.0004427343 }
  0x41   :  { %v231_v54 = vpop.eup %230  ;;  %v159_v22 = vmul.f32 %v428_v42, %v158_v3  ;;  %vm161_vm6 = vcmp.lt.f32.partialorder %v160_v12, 0.0004427343 }
  0x42   :  { %v233_v58 = vpop.eup %232  ;;  %v75_v59 = vsub.f32 %v231_v54, %v414_v27 }
  0x43   :  { %v235_v63 = vpop.eup %234  ;;  %v76_v0 = vsub.f32 %v233_v58, %v416_v28 }
  0x44   :  { %v79_v4 = vmul.f32 %v75_v59, %v75_v59  ;;  %v77_v5 = vsub.f32 %v235_v63, %v418_v30 }
  0x45   :  { %v237_v8 = vpop.eup %236  ;;  %v80_v9 = vmul.f32 %v76_v0, %v76_v0 }
  0x46   :  { %v239_v13 = vpop.eup %238  ;;  %v87_v14 = vmul.f32 0.75, %v79_v4  ;;  %v81_v15 = vmul.f32 %v77_v5, %v77_v5  ;;  %v129_v16 = vmul.f32 0.6931472, %v237_v8 }
  0x47   :  { %v241_v18 = vpop.eup %240  ;;  %v88_v19 = vmul.f32 0.75, %v80_v9  ;;  %v138_v20 = vmul.f32 0.6931472, %v239_v13 }
  0x48   :  { %v243_v23 = vpop.eup %242  ;;  %v91_v24 = vsel %vm83_vm0, %v414_v27, %v87_v14  ;;  %v89_v25 = vmul.f32 0.75, %v81_v15  ;;  %v135_v26 = vsel %vm444_vm3, %v132_v6, %v129_v16  ;;  %v147_v29 = vmul.f32 0.6931472, %v241_v18 }
  0x49   :  { %95 = vst [vmem:[#allocation7] sm:$0xff] %v91_v24  ;;  %v92_v31 = vsel %vm84_vm1, %v416_v28, %v88_v19  ;;  %v78_v32 = vsub.f32 %v243_v23, %v426_v39  ;;  %v144_v33 = vsel %vm448_vm4, %v141_v10, %v138_v20  ;;  %v163_v34 = vadd.f32 %v135_v26, %v107_v55  ;;  %v245_v35 = vpop.eup %244 }
  0x4a   :  { %96 = vst [vmem:[#allocation7 + $0x8] sm:$0xff] %v92_v31  ;;  %v93_v27 = vsel %vm85_vm2, %v418_v30, %v89_v25  ;;  %v153_v36 = vsel %vm453_vm5, %v150_v17, %v147_v29  ;;  %v164_v37 = vadd.f32 %v144_v33, %v108_v60  ;;  %v156_v28 = vmul.f32 0.6931472, %v245_v35 }
  0x4b   :  { %97 = vst [vmem:[#allocation7 + $0x10] sm:$0xff] %v93_v27  ;;  %v82_v38 = vmul.f32 %v78_v32, %v78_v32  ;;  %v165_v40 = vadd.f32 %v153_v36, %v109_v61 }
  0x4c   :  { %v167_v41 = vadd.f32 %v164_v37, %v163_v34  ;;  %v162_v43 = vsel %vm161_vm6, %v159_v22, %v156_v28 }
  0x4d   :  { %v90_v42 = vmul.f32 0.75, %v82_v38  ;;  %v166_v44 = vadd.f32 %v162_v43, %v110_v1 }
  0x4e   :  { %v168_v30 = vadd.f32 %v167_v41, %v165_v40 }
  0x4f   :  { %v94_v45 = vsel %vm86_vm7, %v426_v39, %v90_v42 }
  0x50   :  { %98 = vst [vmem:[#allocation7 + $0x18] sm:$0xff] %v94_v45  ;;  %v169_v46 = vadd.f32 %v168_v30, %v166_v44 }
  0x51   :  { %301 = shalt.err (!%p298_p6)
}
  0x52   :  { %s302_s16 = scalar_lea.hbm %s505_s2, 512 }
  0x53   :  { %p303_p7 = scmp.ne.s32.totalorder %s505_s2, %s302_s16  ;;  %p306_p8 = scmp.lt.u32.totalorder %s302_s16, %s505_s2 }
  0x55   :  { %p308_p9 = pnand %p306_p8, %p303_p7 }
  0x57   :  { %311 = shalt.err (!%p308_p9)
}
  0x58   :  { %183 = dma.vmem_to_hbm [thread:$0]  %s178_s10, 512, %s505_s2, [#allocation4], %s343_s22, %s343_s22, %s344_s23   ;;  %171 = vst [vmem:[#allocation8] sm:$0xff] %v169_v46 }
  0x59   :  { %s312_s25 = scalar_lea.vmem %s191_s12, 128  ;;  %p317_p11 = scmp.lt.s32.totalorder %s191_s12, %s191_s12 }
  0x5a   :  { %p313_p10 = scmp.ne.s32.totalorder %s191_s12, %s312_s25  ;;  %p318_p12 = scmp.lt.s32.totalorder %s312_s25, %s312_s25 }
  0x5c   :  { %p319_p13 = por %p318_p12, %p317_p11 }
  0x5e   :  { %p320_p0 = pnand %p319_p13, %p313_p10 }
  0x60   :  { %323 = shalt.err (!%p320_p0)
}
  0x61   :  { %s324_s28 = scalar_lea.hbm %s506_s3, 128 }
  0x62   :  { %p325_p1 = scmp.ne.s32.totalorder %s506_s3, %s324_s28  ;;  %p328_p2 = scmp.lt.u32.totalorder %s324_s28, %s506_s3 }
  0x64   :  { %p330_p3 = pnand %p328_p2, %p325_p1 }
  0x66   :  { %333 = shalt.err (!%p330_p3)
}
  0x67   :  { %193 = dma.vmem_to_hbm [thread:$0]  %s191_s12, 128, %s506_s3, [#allocation9]  }
  0x68   :  { %338 = dma.done.wait [#allocation4], 512  }
  0x69   :  { %339 = vsyncadd [#allocation4], 4294966784 }
  0x6a   :  { %340 = dma.done.wait [#allocation9], 128  }
  0x6b   :  { %341 = vsyncadd [#allocation9], 4294967168 }
  0x6c   :  { %200 = vsyncpa [#allocation3], 1 }
  0x6d   :  { %201 = vsyncpa [#allocation6], 1 }
  0x6e   :  { %202 = vsyncpa [#allocation4], 1 }
  0x6f   :  { %203 = vsyncpa [#allocation9], 1 }

</bundles_post_ra>
